<compile_context>
chip_gen: v6e
topology: v6e:2x2x1
jax: 0.10.0
libtpu: 0.0.40
codegen_flags: <defaults>
</compile_context>

<pallas_src>
import jax
import jax.numpy as jnp
from jax.experimental import pallas as pl
from jax.experimental.pallas import tpu as pltpu


def suff_net_kernel(x_ref, w_ref, b_ref, o_ref):
    # x_ref: (TB, D) VMEM   batch tile of the input features
    # w_ref: (1, D)  VMEM   nn.Linear weight (resident across the grid)
    # b_ref: (1,)    SMEM   nn.Linear bias (scalar)
    # o_ref: (1, TB) VMEM   lane-dense output tile
    s = jax.lax.dot_general(
        w_ref[...], x_ref[...],
        dimension_numbers=(((1,), (1,)), ((), ())),   # contract D on both: w @ x^T
        preferred_element_type=jnp.float32,           # f32 accumulation
    )                                                 # -> (1, TB), lane-dense
    # NOTE: MXU default precision on f32 inputs differs from a true f32 GEMV by
    # ~1e-3 rel; request Precision.HIGHEST here if closer PyTorch parity is needed.
    o_ref[...] = s + b_ref[0]


def _round_up(n, m):
    return ((n + m - 1) // m) * m


def _vmem_capacity_bytes():
    """Per-generation VMEM capacity (64 MiB on v7x, 128 MiB on v5e/v6e)."""
    try:
        return int(pltpu.get_tpu_info().vmem_capacity_bytes)
    except Exception:
        return 64 * 1024 * 1024        # conservative (v7x-sized) fallback


def _pick_batch_tile(batch, d, itemsize, vmem_cap):
    """Largest lane-aligned batch tile whose double-buffered x stream fits in
    ~3/8 of this generation's VMEM, keeping >= 2 grid steps when the batch
    allows it (so v7x's two TensorCores both get work)."""
    stream_budget = (vmem_cap * 3) // 8            # both x buffers together
    per_buffer = max(1, stream_budget // 2)
    tb = per_buffer // max(1, d * itemsize)        # rows per x buffer
    if batch >= 256:
        tb = min(tb, batch // 2)                   # guarantee >= 2 grid steps
    tb = min(tb, _round_up(batch, 128))            # never bigger than needed
    tb = max(128, (tb // 128) * 128)               # multiple of 128 lanes
    return tb


def suff_net_forward(x, w, b):
    """Pallas implementation of Suff_Net.forward.

    x: (B, D) features (f32 or bf16 — used as stored, no extra HBM cast pass)
    w: (1, D) nn.Linear weight (PyTorch layout)
    b: (1,)   nn.Linear bias
    returns: (B,) f32
    """
    B, D = x.shape
    w = jnp.asarray(w).reshape(1, D).astype(x.dtype)   # cast the tiny weight, not x
    b = jnp.asarray(b, jnp.float32).reshape(1)

    itemsize = jnp.dtype(x.dtype).itemsize
    vmem_cap = _vmem_capacity_bytes()
    tb = _pick_batch_tile(B, D, itemsize, vmem_cap)
    num_tiles = pl.cdiv(B, tb)
    bp = num_tiles * tb            # padded output length; no input pad pass

    cost = pl.CostEstimate(
        flops=2 * B * D,
        transcendentals=0,
        bytes_accessed=B * D * itemsize + D * itemsize + B * 4,
    )

    # NOTE: D is streamed as a single block per tile (fine for typical feature
    # counts).  TODO(synk): add a trailing "arbitrary" reduction grid axis over
    # D with a VMEM f32 accumulator if input_size ever grows past a few thousand.
    out = pl.pallas_call(
        suff_net_kernel,
        out_shape=jax.ShapeDtypeStruct((1, bp), jnp.float32),
        grid=(num_tiles,),
        in_specs=[
            pl.BlockSpec((tb, D), lambda i: (i, 0)),                 # x batch tile
            pl.BlockSpec((1, D), lambda i: (0, 0)),                  # weight (resident)
            pl.BlockSpec(memory_space=pltpu.MemorySpace.SMEM),       # bias scalar
        ],
        out_specs=pl.BlockSpec((1, tb), lambda i: (0, i)),           # lane-dense output
        compiler_params=pltpu.CompilerParams(
            dimension_semantics=("parallel",),      # shard batch grid across TCs
            vmem_limit_bytes=min((vmem_cap * 3) // 4, 64 * 1024 * 1024),
        ),
        cost_estimate=cost,
    )(x, w, b)

    # Trailing [:, 0] squeeze of the Linear output (and drop of the out-of-range
    # tail lanes) is shape glue done here.
    return out[0, :B]


def init_params(key, input_size):
    """Deterministic init matching nn.Linear(input_size, 1) default scheme."""
    kw, kb = jax.random.split(key)
    bound = 1.0 / jnp.sqrt(jnp.float32(input_size))
    w = jax.random.uniform(kw, (1, input_size), jnp.float32, -bound, bound)
    b = jax.random.uniform(kb, (1,), jnp.float32, -bound, bound)
    return w, b


if __name__ == "__main__":
    key = jax.random.PRNGKey(0)
    kx, kp, kx2, kp2 = jax.random.split(key, 4)

    # Small shapes consistent with the module ("hidden_size" in __init__ is unused).
    batch, input_size = 8, 32
    x = jax.random.normal(kx, (batch, input_size), jnp.float32)
    w, b = init_params(kp, input_size)

    y = jax.block_until_ready(suff_net_forward(x, w, b))
    y_ref = (x @ w.T)[:, 0] + b[0]
    assert y.shape == (batch,)
    # Tolerance accounts for MXU default-precision matmul passes on f32 inputs.
    assert jnp.allclose(y, y_ref, atol=2e-3, rtol=2e-3)

    # Multi-tile grid + ragged tail (B not a multiple of the batch tile): no
    # wrapper-side jnp.pad — the last x block reads past the array edge and the
    # resulting garbage lanes (>= B) are sliced off in the wrapper.
    batch2, input_size2 = 600, 96
    x2 = jax.random.normal(kx2, (batch2, input_size2), jnp.float32)
    w2, b2 = init_params(kp2, input_size2)
    y2 = jax.block_until_ready(suff_net_forward(x2, w2, b2))
    y2_ref = (x2 @ w2.T)[:, 0] + b2[0]
    assert y2.shape == (batch2,)
    assert jnp.allclose(y2, y2_ref, atol=2e-3, rtol=2e-3)

    # bf16 path is only taken when x is *already stored* in bf16 upstream (no
    # wrapper cast of x); accumulation stays f32, accuracy is bf16-input level.
    x2_bf16 = x2.astype(jnp.bfloat16)   # stands in for an upstream-bf16 producer
    y2_bf16 = jax.block_until_ready(suff_net_forward(x2_bf16, w2, b2))
    assert jnp.allclose(y2_bf16, y2_ref, atol=3e-2, rtol=3e-2)

    print("KERNEL_OK")
</pallas_src>

<mosaic_0001>
module attributes {stable_mosaic.version = 11 : i64} {
  func.func @suff_net_kernel(%arg0: i32, %arg1: memref<128x32xf32, #tpu.memory_space<vmem>>, %arg2: memref<1x32xf32, #tpu.memory_space<vmem>>, %arg3: memref<1xf32, #tpu.memory_space<smem>>, %arg4: memref<1x128xf32, #tpu.memory_space<vmem>>) attributes {dimension_semantics = [#tpu.dimension_semantics<parallel>], iteration_bounds = array<i64: 1>, scalar_prefetch = 0 : i64, scratch_operands = 0 : i64, tpu.core_type = #tpu.core_type<tc>, window_params = [{transform_indices = @transform_0, window_bounds = array<i64: 128, 32>}, {pipeline_mode = #tpu.pipeline_mode<synchronous>, transform_indices = @transform_1, window_bounds = array<i64: 1, 32>}, {transform_indices = @transform_2, window_bounds = array<i64: 1>}, {transform_indices = @transform_3, window_bounds = array<i64: 1, 128>}]} {
    %c0 = arith.constant 0 : index
    %c0_0 = arith.constant 0 : index
    %0 = vector.load %arg2[%c0, %c0_0] : memref<1x32xf32, #tpu.memory_space<vmem>>, vector<1x32xf32>
    %c0_1 = arith.constant 0 : index
    %c0_2 = arith.constant 0 : index
    %1 = vector.load %arg1[%c0_1, %c0_2] : memref<128x32xf32, #tpu.memory_space<vmem>>, vector<128x32xf32>
    %cst = arith.constant dense<0.000000e+00> : vector<1x128xf32>
    %2 = tpu.matmul %0, %1, %cst {dimension_numbers = #tpu.dot_dimension_numbers<[1], [1], [0], [0], [0, 0, 1, 0], [], []>} : vector<1x32xf32>, vector<128x32xf32>, vector<1x128xf32> -> vector<1x128xf32>
    %c0_3 = arith.constant 0 : index
    %3 = memref.load %arg3[%c0_3] : memref<1xf32, #tpu.memory_space<smem>>
    %4 = vector.broadcast %3 : f32 to vector<1x128xf32>
    %5 = arith.addf %2, %4 : vector<1x128xf32>
    %c0_4 = arith.constant 0 : index
    %c0_5 = arith.constant 0 : index
    %6 = vector.load %arg4[%c0_4, %c0_5] : memref<1x128xf32, #tpu.memory_space<vmem>>, vector<1x128xf32>
    tpu.vector_store %arg4[%c0_4, %c0_5], %5 {strides = array<i32>} : memref<1x128xf32, #tpu.memory_space<vmem>>, vector<1x128xf32>,
    return
  }
  func.func @transform_0(%arg0: i32) -> (i32, i32) {
    %c0_i32 = arith.constant 0 : i32
    %c0_i32_0 = arith.constant 0 : i32
    return %arg0, %c0_i32 : i32, i32
  }
  func.func @transform_1(%arg0: i32) -> (i32, i32) {
    %c0_i32 = arith.constant 0 : i32
    %c0_i32_0 = arith.constant 0 : i32
    %c0_i32_1 = arith.constant 0 : i32
    return %c0_i32, %c0_i32_0 : i32, i32
  }
  func.func @transform_2(%arg0: i32) -> i32 {
    %c0_i32 = arith.constant 0 : i32
    %c0_i32_0 = arith.constant 0 : i32
    return %c0_i32 : i32
  }
  func.func @transform_3(%arg0: i32) -> (i32, i32) {
    %c0_i32 = arith.constant 0 : i32
    %c0_i32_0 = arith.constant 0 : i32
    return %c0_i32, %arg0 : i32, i32
  }
}

</mosaic_0001>

<bundles_post_ra>
// kernel: tpu_custom_call.1
= control target key start
LH: loop header
LB: loop body
LE: loop exit
PB: predicated region body
PF: predicated region fallthrough
CT: control target
= control target key end

     0   :  { %9 = vsyncpa [#allocation4], 0  ;;  %s361_s0 = inlined_call_operand.hbm [shape: f32[8,32], index: 0, kind: input, shape index: {}]   ;;  %s362_s1 = inlined_call_operand.vmem [shape: f32[1,32], index: 1, kind: input, shape index: {}]   ;;  %s363_s2 = inlined_call_operand.<no memory space> [shape: f32[1], index: 2, kind: input, shape index: {}]   ;;  %s364_s3 = inlined_call_operand.hbm [shape: f32[1,128], index: 3, kind: output, shape index: {}]  }
   0x1   :  { %10 = vsyncpa [#allocation5], 0 }
   0x2   :  { %15 = vsyncadd [#allocation4], 1920  ;;  %s306_s12 = smov [#allocation3]  }
   0x3   :  { %s16_s13 = sshll.u32 %s306_s12, 4  ;;  %s17_s13 = int_to_ptr.vmem [resolvable:$true] %s16_s13 }
   0x4   :  { %s270_s14 = scalar_lea.vmem %s17_s13, 128  ;;  %s274_s15 = scalar_lea.vmem %s17_s13, 2048 }
   0x5   :  { %p271_p0 = scmp.ne.s32.totalorder %s17_s13, %s270_s14  ;;  %p275_p1 = scmp.lt.s32.totalorder %s17_s13, %s17_s13 }
   0x6   :  { %p276_p2 = scmp.lt.s32.totalorder %s274_s15, %s270_s14 }
   0x8   :  { %p277_p3 = por %p276_p2, %p275_p1 }
   0xa   :  { %p278_p4 = pnand %p277_p3, %p271_p0 }
   0xc   :  { %281 = shalt.err (!%p278_p4)
}
   0xd   :  { %s307_s16 = smov 128   ;;  %s308_s17 = smov 8  }
   0xe   :  { %22 = dma.hbm_to_vmem [thread:$0]  %s361_s0, 128, %s17_s13, [#allocation4], %s307_s16, %s307_s16, %s308_s17  }
   0xf   :  { %302 = dma.done.wait [#allocation4], 2048  }
  0x10   :  { %303 = vsyncadd [#allocation4], 4294965248  ;;  %v309_v0 = vmov 0.0   ;;  %vm310_vm0 = vmmov 0   ;;  %vm49_vm1 = vcmask 261120   ;;  %v46_v1 = vld [vmem:[#allocation3 + $0x78] sm:$0xff]  ;;  %v48_v18 = vstv %s363_s2 }
  0x11   :  { %221 = vmatprep.subr.mxu0 %v309_v0  ;;  %253 = vmatprep.mubr.msk.f32.mxu0 %vm310_vm0, %v309_v0  ;;  %v45_v2 = vld [vmem:[#allocation3 + $0x70] sm:$0xff]  ;;  %v44_v3 = vld [vmem:[#allocation3 + $0x68] sm:$0xff]  ;;  %v43_v4 = vld [vmem:[#allocation3 + $0x60] sm:$0xff]  ;;  %s311_s23 = smov [#allocation6]  }
  0x12   :  { %222 = vmatpush3.xpose.msk.msra.mxu0 %vm49_vm1, %v46_v1  ;;  %v42_v5 = vld [vmem:[#allocation3 + $0x58] sm:$0xff]  ;;  %v41_v6 = vld [vmem:[#allocation3 + $0x50] sm:$0xff]  ;;  %v40_v7 = vld [vmem:[#allocation3 + $0x48] sm:$0xff]  ;;  %s178_s24 = sshll.u32 %s311_s23, 4  ;;  %s179_s24 = int_to_ptr.vmem [resolvable:$true] %s178_s24 }
  0x13   :  { %223 = vmatprep.subr.mxu0 %v309_v0  ;;  %v39_v8 = vld [vmem:[#allocation3 + $0x40] sm:$0xff]  ;;  %v38_v9 = vld [vmem:[#allocation3 + $0x38] sm:$0xff]  ;;  %v37_v10 = vld [vmem:[#allocation3 + $0x30] sm:$0xff]  ;;  %s282_s25 = scalar_lea.vmem %s179_s24, 16  ;;  %s286_s26 = scalar_lea.vmem %s179_s24, 32 }
  0x14   :  { %v36_v11 = vld [vmem:[#allocation3 + $0x28] sm:$0xff]  ;;  %v35_v12 = vld [vmem:[#allocation3 + $0x20] sm:$0xff]  ;;  %v34_v13 = vld [vmem:[#allocation3 + $0x18] sm:$0xff]  ;;  %p283_p5 = scmp.ne.s32.totalorder %s179_s24, %s282_s25  ;;  %p287_p6 = scmp.lt.s32.totalorder %s179_s24, %s179_s24 }
  0x15   :  { %v33_v14 = vld [vmem:[#allocation3 + $0x10] sm:$0xff]  ;;  %v32_v15 = vld [vmem:[#allocation3 + $0x8] sm:$0xff]  ;;  %v31_v16 = vld [vmem:[#allocation3] sm:$0xff]  ;;  %p288_p7 = scmp.lt.s32.totalorder %s286_s26, %s282_s25 }
  0x16   :  { %224 = vmatpush3.xpose.msk.msra.mxu0 %vm49_vm1, %v45_v2  ;;  %v30_v17 = vld [vmem:[%s362_s1] sm:$0x1] }
  0x17   :  { %225 = vmatprep.subr.mxu0 %v309_v0  ;;  %p289_p8 = por %p288_p7, %p287_p6 }
  0x19   :  { %p290_p9 = pnand %p289_p8, %p283_p5 }
  0x1a   :  { %226 = vmatpush3.xpose.msk.msra.mxu0 %vm49_vm1, %v44_v3 }
  0x1b   :  { %227 = vmatprep.subr.mxu0 %v309_v0 }
  0x1e   :  { %228 = vmatpush3.xpose.msk.msra.mxu0 %vm49_vm1, %v43_v4 }
  0x1f   :  { %229 = vmatprep.subr.mxu0 %v309_v0 }
  0x22   :  { %230 = vmatpush3.xpose.msk.msra.mxu0 %vm49_vm1, %v42_v5 }
  0x23   :  { %231 = vmatprep.subr.mxu0 %v309_v0 }
  0x26   :  { %232 = vmatpush3.xpose.msk.msra.mxu0 %vm49_vm1, %v41_v6 }
  0x27   :  { %233 = vmatprep.subr.mxu0 %v309_v0 }
  0x2a   :  { %234 = vmatpush3.xpose.msk.msra.mxu0 %vm49_vm1, %v40_v7 }
  0x2b   :  { %235 = vmatprep.subr.mxu0 %v309_v0 }
  0x2e   :  { %236 = vmatpush3.xpose.msk.msra.mxu0 %vm49_vm1, %v39_v8 }
  0x2f   :  { %237 = vmatprep.subr.mxu0 %v309_v0 }
  0x32   :  { %238 = vmatpush3.xpose.msk.msra.mxu0 %vm49_vm1, %v38_v9 }
  0x33   :  { %239 = vmatprep.subr.mxu0 %v309_v0 }
  0x36   :  { %240 = vmatpush3.xpose.msk.msra.mxu0 %vm49_vm1, %v37_v10 }
  0x37   :  { %241 = vmatprep.subr.mxu0 %v309_v0 }
  0x3a   :  { %242 = vmatpush3.xpose.msk.msra.mxu0 %vm49_vm1, %v36_v11 }
  0x3b   :  { %243 = vmatprep.subr.mxu0 %v309_v0 }
  0x3e   :  { %244 = vmatpush3.xpose.msk.msra.mxu0 %vm49_vm1, %v35_v12 }
  0x3f   :  { %245 = vmatprep.subr.mxu0 %v309_v0 }
  0x42   :  { %246 = vmatpush3.xpose.msk.msra.mxu0 %vm49_vm1, %v34_v13 }
  0x43   :  { %247 = vmatprep.subr.mxu0 %v309_v0 }
  0x46   :  { %248 = vmatpush3.xpose.msk.msra.mxu0 %vm49_vm1, %v33_v14 }
  0x47   :  { %249 = vmatprep.subr.mxu0 %v309_v0 }
  0x4a   :  { %250 = vmatpush3.xpose.msk.msra.mxu0 %vm49_vm1, %v32_v15 }
  0x4b   :  { %251 = vmatprep.subr.mxu0 %v309_v0 }
  0x4e   :  { %252 = vmatpush3.xpose.msk.msra.mxu0 %vm49_vm1, %v31_v16 }
  0x51   :  { %254 = vmatmul.mubr.msk.f32.vlgmr.msra.gmra.mxu0 %vm49_vm1, %v30_v17 }
 0x111   :  { %v167_v19 = vpop.f32.mrf.mxu0 }
 0x112   :  { %v168_v20 = vadd.f32 %v167_v19, %v48_v18 }
 0x113   :  { %v255_v21 = vpop.f32.mrf.mxu0 }
 0x114   :  { %171 = vst [vmem:[#allocation6] sm:$0x1] %v168_v20 }
 0x115   :  { %293 = shalt.err (!%p290_p9)
}
 0x116   :  { %181 = dma.vmem_to_hbm [thread:$0]  %s179_s24, 16, %s364_s3, [#allocation5]  }
 0x117   :  { %304 = dma.done.wait [#allocation5], 16  }
 0x118   :  { %305 = vsyncadd [#allocation5], 4294967280 }
 0x119   :  { %185 = vsyncpa [#allocation4], 1 }
 0x11a   :  { %186 = vsyncpa [#allocation5], 1 }

</bundles_post_ra>
